<compile_context>
chip_gen: v6e
topology: v6e:2x2x1
jax: 0.10.0
libtpu: 0.0.40
codegen_flags: <defaults>
</compile_context>

<pallas_src>
import functools
import math

import jax
import jax.numpy as jnp
from jax.experimental import pallas as pl
from jax.experimental.pallas import tpu as pltpu

MIB = 1024 * 1024


def _cdiv(a, b):
    return -(-a // b)


def _tpu_vmem_capacity():
    try:
        info = pltpu.get_tpu_info()
        return int(getattr(info, "vmem_capacity_bytes", 128 * MIB))
    except Exception:
        return 128 * MIB


def _plan_blocks(N, C, H, W, itemsize, const_bytes):
    """Generation-aware block size / row-chunking / VMEM-limit selection."""
    HW = H * W
    vmem_cap = _tpu_vmem_capacity()
    small_vmem = vmem_cap <= 96 * MIB            # v7x-like: 64 MiB per TensorCore
    target_x_bytes = (6 if small_vmem else 12) * MIB
    min_grid_steps = 4 if small_vmem else 1      # >= 2 pipelined steps per TC (v7x: 2 TCs)
    budget = int(0.70 * vmem_cap)

    per_image = C * HW * itemsize
    nb = max(1, min(N, target_x_bytes // max(1, per_image)))
    if min_grid_steps > 1 and N >= min_grid_steps:
        nb = min(nb, max(1, N // min_grid_steps))

    # Keep the block's sublane dim (nb*C) a multiple of 8 for the (8, 128) rule.
    g = 8 // math.gcd(C, 8)
    nb = max(g, (nb // g) * g)

    def plan_for(nb_):
        rows = nb_ * C
        # Row chunks for the gate stage: ~2 MiB of f32 per temporary, and a
        # bounded number of statically unrolled chunks.
        base = max(8, ((2 * MIB) // (HW * 4)) // 8 * 8)
        base = max(base, _cdiv(_cdiv(rows, 32), 8) * 8)
        base = min(rows, base)
        chunks = tuple((r, min(base, rows - r)) for r in range(0, rows, base))
        blk = rows * HW * itemsize
        scr = rows * 2 * (H + W) * 4                       # pooled + out_h + out_w (f32)
        tmp = base * HW * (3 * 4 + itemsize)               # gh, gw, gate (f32) + x chunk
        need = 4 * blk + const_bytes + scr + tmp + 2 * MIB  # 2x in + 2x out buffers
        return chunks, need

    chunks, need = plan_for(nb)
    while nb > g and need > budget:
        nb = max(g, ((nb // 2) // g) * g)
        chunks, need = plan_for(nb)

    vmem_limit = int(min(int(0.9 * vmem_cap), max(32 * MIB, need + 16 * MIB)))
    return nb, chunks, vmem_limit


def _coord_attn_kernel(x_ref, p_ref, eh_ref, ew_ref,
                       w1_ref, b1_ref, w2_ref, b2_ref, w3_ref, b3_ref,
                       out_ref, pooled_scr, oh_scr, ow_scr,
                       *, C, H, W, nb, chunks, big_prec):
    f32 = jnp.float32
    hi = jax.lax.Precision.HIGHEST

    # Invariant operands: their block index never changes so they are only
    # DMA'd once; hoist all loads out of the loops.
    P = p_ref[...]          # (HW, H+W)  [mean-over-w | mean-over-h] pooling matrix
    Eh = eh_ref[...]        # (H, HW)    0/1: repeat a per-h gate over w
    Ew = ew_ref[...]        # (W, HW)    0/1: tile a per-w gate over h
    w1 = w1_ref[...]        # (T, C) f32 (eval-mode BN folded in)
    b1 = b1_ref[...]        # (T, 1)
    w2 = w2_ref[...]        # (C, T)
    b2 = b2_ref[...]        # (C, 1)
    w3 = w3_ref[...]        # (C, T)
    b3 = b3_ref[...]        # (C, 1)

    # ---- Stage 1: coordinate avg-pooling, batched over the whole block ----
    # (rows, HW) @ (HW, H+W) -> (rows, H+W), f32 accumulation on the MXU.
    # x stays in its native dtype (no full-resolution upcast).
    for r0, rc in chunks:
        pooled_scr[pl.ds(r0, rc), :] = jnp.dot(
            x_ref[pl.ds(r0, rc), :], P,
            preferred_element_type=f32, precision=big_prec)

    # ---- Stage 2: tiny per-image 1x1 convs (channel mixing) ---------------
    def one_image(r0):
        pooled_b = pooled_scr[pl.ds(r0, C), :]                      # (C, H+W) f32
        y = jnp.dot(w1, pooled_b, preferred_element_type=f32, precision=hi) + b1
        y = y * (jnp.clip(y + 3.0, 0.0, 6.0) * (1.0 / 6.0))         # h_swish
        oh_scr[pl.ds(r0, C), :] = jax.nn.sigmoid(
            jnp.dot(w2, y[:, :H], preferred_element_type=f32, precision=hi) + b2)
        ow_scr[pl.ds(r0, C), :] = jax.nn.sigmoid(
            jnp.dot(w3, y[:, H:], preferred_element_type=f32, precision=hi) + b3)

    if nb <= 32:
        for b in range(nb):                    # small & static: fully static slices
            one_image(b * C)
    else:
        def body(b, carry):                    # large blocks: real loop, no unroll
            one_image(pl.multiple_of(b * C, C))
            return carry
        jax.lax.fori_loop(0, nb, body, 0)

    # ---- Stage 3: gate expansion + gating, chunked over row tiles ---------
    # Only one chunk of the f32 gh/gw/gate temporaries is live at a time.
    for r0, rc in chunks:
        oh_c = oh_scr[pl.ds(r0, rc), :].astype(Eh.dtype)            # (rc, H)
        ow_c = ow_scr[pl.ds(r0, rc), :].astype(Ew.dtype)            # (rc, W)
        gh = jnp.dot(oh_c, Eh, preferred_element_type=f32, precision=big_prec)
        gw = jnp.dot(ow_c, Ew, preferred_element_type=f32, precision=big_prec)
        xc = x_ref[pl.ds(r0, rc), :]
        out_ref[pl.ds(r0, rc), :] = (xc * (gh * gw).astype(xc.dtype)).astype(out_ref.dtype)


def coord_attention(x, params, eps=1e-5,
                    big_matmul_precision=jax.lax.Precision.DEFAULT):
    """CoordAttention forward pass (eval-mode BatchNorm folded into conv1)."""
    N, C, H, W = x.shape
    HW = H * W
    f32 = jnp.float32
    cdtype = x.dtype

    if params["w2"].shape[0] != C or params["w3"].shape[0] != C:
        raise ValueError("gating requires out_channels == in_channels")

    # --- fold eval-mode BatchNorm into conv1 --------------------------------
    scale = params["gamma"] / jnp.sqrt(params["var"] + eps)           # (T, 1)
    w1f = (params["w1"] * scale).astype(f32)                          # (T, C)
    b1f = ((params["b1"] - params["mean"]) * scale + params["beta"]).astype(f32)
    w2 = params["w2"].astype(f32)
    b2 = params["b2"].astype(f32)
    w3 = params["w3"].astype(f32)
    b3 = params["b3"].astype(f32)

    # --- pooling / gate-expansion matrices (host side, tiny) ----------------
    s = jnp.arange(HW)
    Eh = (s[None, :] // W == jnp.arange(H)[:, None]).astype(f32)      # (H, HW)
    Ew = (s[None, :] % W == jnp.arange(W)[:, None]).astype(f32)       # (W, HW)
    P = jnp.concatenate([Eh.T / W, Ew.T / H], axis=1)                 # (HW, H+W)
    # Big-matmul operands live in the input dtype (a single bf16 MXU pass when
    # the activations are bf16); accumulation stays f32 via preferred_element_type.
    P = P.astype(cdtype)
    Eh = Eh.astype(cdtype)
    Ew = Ew.astype(cdtype)

    # --- lane-dense 2-D view: rows = (image, channel), lanes = H*W ----------
    x2 = x.reshape(N * C, HW)

    const_bytes = (2 * int(P.size + Eh.size + Ew.size) * P.dtype.itemsize
                   + 2 * sum(int(a.size) * 4 for a in (w1f, b1f, w2, b2, w3, b3))
                   + 64 * 1024)
    nb, chunks, vmem_limit = _plan_blocks(N, C, H, W, x.dtype.itemsize, const_bytes)

    grid = _cdiv(N, nb)
    n_pad = grid * nb
    if n_pad != N:
        # cdiv grid + zero padding instead of degrading nb to a divisor of N.
        x2 = jnp.pad(x2, ((0, (n_pad - N) * C), (0, 0)))

    rows = nb * C
    kernel = functools.partial(_coord_attn_kernel, C=C, H=H, W=W, nb=nb,
                               chunks=chunks, big_prec=big_matmul_precision)
    consts = (P, Eh, Ew, w1f, b1f, w2, b2, w3, b3)

    def call(single_buffer_consts):
        def const_spec(a):
            idx = lambda i, _nd=a.ndim: (0,) * _nd
            if single_buffer_consts:
                return pl.BlockSpec(a.shape, idx, pipeline_mode=pl.Buffered(1))
            return pl.BlockSpec(a.shape, idx)

        return pl.pallas_call(
            kernel,
            out_shape=jax.ShapeDtypeStruct((n_pad * C, HW), x.dtype),
            grid=(grid,),
            in_specs=[pl.BlockSpec((rows, HW), lambda i: (i, 0))]
                     + [const_spec(a) for a in consts],
            out_specs=pl.BlockSpec((rows, HW), lambda i: (i, 0)),
            scratch_shapes=[
                pltpu.VMEM((rows, H + W), jnp.float32),   # pooled [mean_w | mean_h]
                pltpu.VMEM((rows, H), jnp.float32),       # sigmoid(conv2): per-(c,h) gate
                pltpu.VMEM((rows, W), jnp.float32),       # sigmoid(conv3): per-(c,w) gate
            ],
            compiler_params=pltpu.CompilerParams(
                dimension_semantics=("parallel",),
                vmem_limit_bytes=vmem_limit,
            ),
        )(x2, *consts)

    # Invariant operands do not need double buffering; only bother (and only
    # risk the newer pipeline_mode API) when they are big enough to matter,
    # and fall back gracefully if this Pallas version rejects it.
    want_single = hasattr(pl, "Buffered") and const_bytes > 4 * MIB
    try:
        out2 = call(want_single)
        if want_single:
            jax.block_until_ready(out2)
    except Exception:
        if not want_single:
            raise
        out2 = call(False)

    if n_pad != N:
        out2 = out2[: N * C]
    return out2.reshape(N, C, H, W)


def coord_attention_ref(x, p, eps=1e-5):
    """Pure-jnp reference mirroring the PyTorch forward (eval-mode BN)."""
    N, C, H, W = x.shape
    hp = jax.lax.Precision.HIGHEST
    x_h = jnp.mean(x, axis=3)                          # (N, C, H)  pool over W
    x_w = jnp.mean(x, axis=2)                          # (N, C, W)  pool over H
    cat = jnp.concatenate([x_h, x_w], axis=2)          # (N, C, H+W)
    y = jnp.einsum("tc,ncs->nts", p["w1"], cat, precision=hp) + p["b1"][None]
    y = (y - p["mean"][None]) / jnp.sqrt(p["var"][None] + eps) * p["gamma"][None] + p["beta"][None]
    y = y * jnp.clip(y + 3.0, 0.0, 6.0) / 6.0
    y_h, y_w = y[:, :, :H], y[:, :, H:]
    oh = jax.nn.sigmoid(jnp.einsum("ot,nts->nos", p["w2"], y_h, precision=hp) + p["b2"][None])
    ow = jax.nn.sigmoid(jnp.einsum("ot,nts->nos", p["w3"], y_w, precision=hp) + p["b3"][None])
    return x * ow[:, :, None, :] * oh[:, :, :, None]


if __name__ == "__main__":
    N, C, H, W = 2, 4, 16, 16
    reduction = 16
    T = max(8, C // reduction)   # temp_c; out_channels == in_channels == C

    key = jax.random.PRNGKey(0)
    ks = jax.random.split(key, 7)
    x = jax.random.normal(ks[0], (N, C, H, W), jnp.float32)

    params = {
        "w1": 0.1 * jax.random.normal(ks[1], (T, C), jnp.float32),
        "b1": 0.1 * jax.random.normal(ks[2], (T, 1), jnp.float32),
        "gamma": jnp.ones((T, 1), jnp.float32),
        "beta": jnp.zeros((T, 1), jnp.float32),
        "mean": jnp.zeros((T, 1), jnp.float32),
        "var": jnp.ones((T, 1), jnp.float32),
        "w2": 0.1 * jax.random.normal(ks[3], (C, T), jnp.float32),
        "b2": 0.1 * jax.random.normal(ks[4], (C, 1), jnp.float32),
        "w3": 0.1 * jax.random.normal(ks[5], (C, T), jnp.float32),
        "b3": 0.1 * jax.random.normal(ks[6], (C, 1), jnp.float32),
    }

    out = coord_attention(x, params)
    jax.block_until_ready(out)

    ref = coord_attention_ref(x, params)
    assert out.shape == (N, C, H, W)
    # Tolerance allows for DEFAULT-precision (single bf16-pass) MXU matmuls on
    # the pooling / gate-expansion path; the tiny 1x1 convs stay HIGHEST.
    max_err = float(jnp.max(jnp.abs(out - ref)))
    assert jnp.allclose(out, ref, atol=2e-2, rtol=2e-2), \
        f"mismatch vs reference (max abs err {max_err})"

    print("KERNEL_OK")
</pallas_src>

<mosaic_0001>
module attributes {stable_mosaic.version = 11 : i64} {
  func.func @_coord_attn_kernel(%arg0: i32, %arg1: memref<8x256xf32, #tpu.memory_space<vmem>>, %arg2: memref<256x32xf32, #tpu.memory_space<vmem>>, %arg3: memref<16x256xf32, #tpu.memory_space<vmem>>, %arg4: memref<16x256xf32, #tpu.memory_space<vmem>>, %arg5: memref<8x4xf32, #tpu.memory_space<vmem>>, %arg6: memref<8x1xf32, #tpu.memory_space<vmem>>, %arg7: memref<4x8xf32, #tpu.memory_space<vmem>>, %arg8: memref<4x1xf32, #tpu.memory_space<vmem>>, %arg9: memref<4x8xf32, #tpu.memory_space<vmem>>, %arg10: memref<4x1xf32, #tpu.memory_space<vmem>>, %arg11: memref<8x256xf32, #tpu.memory_space<vmem>>, %arg12: memref<8x32xf32, #tpu.memory_space<vmem>>, %arg13: memref<8x16xf32, #tpu.memory_space<vmem>>, %arg14: memref<8x16xf32, #tpu.memory_space<vmem>>) attributes {dimension_semantics = [#tpu.dimension_semantics<parallel>], iteration_bounds = array<i64: 1>, scalar_prefetch = 0 : i64, scratch_operands = 3 : i64, tpu.core_type = #tpu.core_type<tc>, window_params = [{transform_indices = @transform_0, window_bounds = array<i64: 8, 256>}, {pipeline_mode = #tpu.pipeline_mode<synchronous>, transform_indices = @transform_1, window_bounds = array<i64: 256, 32>}, {pipeline_mode = #tpu.pipeline_mode<synchronous>, transform_indices = @transform_2, window_bounds = array<i64: 16, 256>}, {pipeline_mode = #tpu.pipeline_mode<synchronous>, transform_indices = @transform_3, window_bounds = array<i64: 16, 256>}, {pipeline_mode = #tpu.pipeline_mode<synchronous>, transform_indices = @transform_4, window_bounds = array<i64: 8, 4>}, {pipeline_mode = #tpu.pipeline_mode<synchronous>, transform_indices = @transform_5, window_bounds = array<i64: 8, 1>}, {pipeline_mode = #tpu.pipeline_mode<synchronous>, transform_indices = @transform_6, window_bounds = array<i64: 4, 8>}, {pipeline_mode = #tpu.pipeline_mode<synchronous>, transform_indices = @transform_7, window_bounds = array<i64: 4, 1>}, {pipeline_mode = #tpu.pipeline_mode<synchronous>, transform_indices = @transform_8, window_bounds = array<i64: 4, 8>}, {pipeline_mode = #tpu.pipeline_mode<synchronous>, transform_indices = @transform_9, window_bounds = array<i64: 4, 1>}, {transform_indices = @transform_10, window_bounds = array<i64: 8, 256>}]} {
    %c0 = arith.constant 0 : index
    %c0_0 = arith.constant 0 : index
    %0 = vector.load %arg2[%c0, %c0_0] : memref<256x32xf32, #tpu.memory_space<vmem>>, vector<256x32xf32>
    %c0_1 = arith.constant 0 : index
    %c0_2 = arith.constant 0 : index
    %1 = vector.load %arg3[%c0_1, %c0_2] : memref<16x256xf32, #tpu.memory_space<vmem>>, vector<16x256xf32>
    %c0_3 = arith.constant 0 : index
    %c0_4 = arith.constant 0 : index
    %2 = vector.load %arg4[%c0_3, %c0_4] : memref<16x256xf32, #tpu.memory_space<vmem>>, vector<16x256xf32>
    %c0_5 = arith.constant 0 : index
    %c0_6 = arith.constant 0 : index
    %3 = vector.load %arg5[%c0_5, %c0_6] : memref<8x4xf32, #tpu.memory_space<vmem>>, vector<8x4xf32>
    %c0_7 = arith.constant 0 : index
    %c0_8 = arith.constant 0 : index
    %4 = vector.load %arg6[%c0_7, %c0_8] : memref<8x1xf32, #tpu.memory_space<vmem>>, vector<8x1xf32>
    %c0_9 = arith.constant 0 : index
    %c0_10 = arith.constant 0 : index
    %5 = vector.load %arg7[%c0_9, %c0_10] : memref<4x8xf32, #tpu.memory_space<vmem>>, vector<4x8xf32>
    %c0_11 = arith.constant 0 : index
    %c0_12 = arith.constant 0 : index
    %6 = vector.load %arg8[%c0_11, %c0_12] : memref<4x1xf32, #tpu.memory_space<vmem>>, vector<4x1xf32>
    %c0_13 = arith.constant 0 : index
    %c0_14 = arith.constant 0 : index
    %7 = vector.load %arg9[%c0_13, %c0_14] : memref<4x8xf32, #tpu.memory_space<vmem>>, vector<4x8xf32>
    %c0_15 = arith.constant 0 : index
    %c0_16 = arith.constant 0 : index
    %8 = vector.load %arg10[%c0_15, %c0_16] : memref<4x1xf32, #tpu.memory_space<vmem>>, vector<4x1xf32>
    %c0_17 = arith.constant 0 : index
    %c0_18 = arith.constant 0 : index
    %9 = vector.load %arg1[%c0_17, %c0_18] : memref<8x256xf32, #tpu.memory_space<vmem>>, vector<8x256xf32>
    %cst = arith.constant dense<0.000000e+00> : vector<8x32xf32>
    %10 = tpu.matmul %9, %0, %cst {dimension_numbers = #tpu.dot_dimension_numbers<[1], [0], [0], [1], [0, 0, 1, 1], [], []>} : vector<8x256xf32>, vector<256x32xf32>, vector<8x32xf32> -> vector<8x32xf32>
    %c0_19 = arith.constant 0 : index
    %c0_20 = arith.constant 0 : index
    %11 = vector.load %arg12[%c0_19, %c0_20] : memref<8x32xf32, #tpu.memory_space<vmem>>, vector<8x32xf32>
    tpu.vector_store %arg12[%c0_19, %c0_20], %10 {strides = array<i32>} : memref<8x32xf32, #tpu.memory_space<vmem>>, vector<8x32xf32>,
    %c0_21 = arith.constant 0 : index
    %c0_22 = arith.constant 0 : index
    %12 = vector.load %arg12[%c0_21, %c0_22] : memref<8x32xf32, #tpu.memory_space<vmem>>, vector<4x32xf32>
    %cst_23 = arith.constant dense<0.000000e+00> : vector<8x32xf32>
    %13 = tpu.matmul %3, %12, %cst_23 {dimension_numbers = #tpu.dot_dimension_numbers<[1], [0], [0], [1], [0, 0, 1, 1], [], []>, precision = #tpu.contract_precision<fp32>} : vector<8x4xf32>, vector<4x32xf32>, vector<8x32xf32> -> vector<8x32xf32>
    %14 = vector.broadcast %4 : vector<8x1xf32> to vector<8x32xf32>
    %15 = arith.addf %13, %14 : vector<8x32xf32>
    %cst_24 = arith.constant 3.000000e+00 : f32
    %16 = vector.broadcast %cst_24 : f32 to vector<8x32xf32>
    %17 = arith.addf %15, %16 : vector<8x32xf32>
    %cst_25 = arith.constant 0.000000e+00 : f32
    %cst_26 = arith.constant 6.000000e+00 : f32
    %18 = vector.broadcast %cst_25 : f32 to vector<8x32xf32>
    %19 = arith.maximumf %18, %17 : vector<8x32xf32>
    %20 = vector.broadcast %cst_26 : f32 to vector<8x32xf32>
    %21 = arith.minimumf %20, %19 : vector<8x32xf32>
    %cst_27 = arith.constant 0.166666672 : f32
    %22 = vector.broadcast %cst_27 : f32 to vector<8x32xf32>
    %23 = arith.mulf %21, %22 : vector<8x32xf32>
    %24 = arith.mulf %15, %23 : vector<8x32xf32>
    %25 = vector.extract_strided_slice %24 {offsets = [0, 0], sizes = [8, 16], strides = [1, 1]} : vector<8x32xf32> to vector<8x16xf32>
    %cst_28 = arith.constant dense<0.000000e+00> : vector<4x16xf32>
    %26 = tpu.matmul %5, %25, %cst_28 {dimension_numbers = #tpu.dot_dimension_numbers<[1], [0], [0], [1], [0, 0, 1, 1], [], []>, precision = #tpu.contract_precision<fp32>} : vector<4x8xf32>, vector<8x16xf32>, vector<4x16xf32> -> vector<4x16xf32>
    %27 = vector.broadcast %6 : vector<4x1xf32> to vector<4x16xf32>
    %28 = arith.addf %26, %27 : vector<4x16xf32>
    %29 = arith.negf %28 : vector<4x16xf32>
    %30 = math.exp %29 : vector<4x16xf32>
    %cst_29 = arith.constant 1.000000e+00 : f32
    %31 = vector.broadcast %cst_29 : f32 to vector<4x16xf32>
    %32 = arith.addf %31, %30 : vector<4x16xf32>
    %33 = arith.divf %31, %32 : vector<4x16xf32>
    %c0_30 = arith.constant 0 : index
    %c0_31 = arith.constant 0 : index
    %34 = vector.load %arg13[%c0_30, %c0_31] : memref<8x16xf32, #tpu.memory_space<vmem>>, vector<4x16xf32>
    tpu.vector_store %arg13[%c0_30, %c0_31], %33 {strides = array<i32>} : memref<8x16xf32, #tpu.memory_space<vmem>>, vector<4x16xf32>,
    %35 = vector.extract_strided_slice %24 {offsets = [0, 16], sizes = [8, 16], strides = [1, 1]} : vector<8x32xf32> to vector<8x16xf32>
    %cst_32 = arith.constant dense<0.000000e+00> : vector<4x16xf32>
    %36 = tpu.matmul %7, %35, %cst_32 {dimension_numbers = #tpu.dot_dimension_numbers<[1], [0], [0], [1], [0, 0, 1, 1], [], []>, precision = #tpu.contract_precision<fp32>} : vector<4x8xf32>, vector<8x16xf32>, vector<4x16xf32> -> vector<4x16xf32>
    %37 = vector.broadcast %8 : vector<4x1xf32> to vector<4x16xf32>
    %38 = arith.addf %36, %37 : vector<4x16xf32>
    %39 = arith.negf %38 : vector<4x16xf32>
    %40 = math.exp %39 : vector<4x16xf32>
    %cst_33 = arith.constant 1.000000e+00 : f32
    %41 = vector.broadcast %cst_33 : f32 to vector<4x16xf32>
    %42 = arith.addf %41, %40 : vector<4x16xf32>
    %43 = arith.divf %41, %42 : vector<4x16xf32>
    %c0_34 = arith.constant 0 : index
    %c0_35 = arith.constant 0 : index
    %44 = vector.load %arg14[%c0_34, %c0_35] : memref<8x16xf32, #tpu.memory_space<vmem>>, vector<4x16xf32>
    tpu.vector_store %arg14[%c0_34, %c0_35], %43 {strides = array<i32>} : memref<8x16xf32, #tpu.memory_space<vmem>>, vector<4x16xf32>,
    %c4 = arith.constant 4 : index
    %c0_36 = arith.constant 0 : index
    %45 = vector.load %arg12[%c4, %c0_36] : memref<8x32xf32, #tpu.memory_space<vmem>>, vector<4x32xf32>
    %cst_37 = arith.constant dense<0.000000e+00> : vector<8x32xf32>
    %46 = tpu.matmul %3, %45, %cst_37 {dimension_numbers = #tpu.dot_dimension_numbers<[1], [0], [0], [1], [0, 0, 1, 1], [], []>, precision = #tpu.contract_precision<fp32>} : vector<8x4xf32>, vector<4x32xf32>, vector<8x32xf32> -> vector<8x32xf32>
    %47 = vector.broadcast %4 : vector<8x1xf32> to vector<8x32xf32>
    %48 = arith.addf %46, %47 : vector<8x32xf32>
    %cst_38 = arith.constant 3.000000e+00 : f32
    %49 = vector.broadcast %cst_38 : f32 to vector<8x32xf32>
    %50 = arith.addf %48, %49 : vector<8x32xf32>
    %cst_39 = arith.constant 0.000000e+00 : f32
    %cst_40 = arith.constant 6.000000e+00 : f32
    %51 = vector.broadcast %cst_39 : f32 to vector<8x32xf32>
    %52 = arith.maximumf %51, %50 : vector<8x32xf32>
    %53 = vector.broadcast %cst_40 : f32 to vector<8x32xf32>
    %54 = arith.minimumf %53, %52 : vector<8x32xf32>
    %cst_41 = arith.constant 0.166666672 : f32
    %55 = vector.broadcast %cst_41 : f32 to vector<8x32xf32>
    %56 = arith.mulf %54, %55 : vector<8x32xf32>
    %57 = arith.mulf %48, %56 : vector<8x32xf32>
    %58 = vector.extract_strided_slice %57 {offsets = [0, 0], sizes = [8, 16], strides = [1, 1]} : vector<8x32xf32> to vector<8x16xf32>
    %cst_42 = arith.constant dense<0.000000e+00> : vector<4x16xf32>
    %59 = tpu.matmul %5, %58, %cst_42 {dimension_numbers = #tpu.dot_dimension_numbers<[1], [0], [0], [1], [0, 0, 1, 1], [], []>, precision = #tpu.contract_precision<fp32>} : vector<4x8xf32>, vector<8x16xf32>, vector<4x16xf32> -> vector<4x16xf32>
    %60 = vector.broadcast %6 : vector<4x1xf32> to vector<4x16xf32>
    %61 = arith.addf %59, %60 : vector<4x16xf32>
    %62 = arith.negf %61 : vector<4x16xf32>
    %63 = math.exp %62 : vector<4x16xf32>
    %cst_43 = arith.constant 1.000000e+00 : f32
    %64 = vector.broadcast %cst_43 : f32 to vector<4x16xf32>
    %65 = arith.addf %64, %63 : vector<4x16xf32>
    %66 = arith.divf %64, %65 : vector<4x16xf32>
    %c4_44 = arith.constant 4 : index
    %c0_45 = arith.constant 0 : index
    %67 = vector.load %arg13[%c4_44, %c0_45] : memref<8x16xf32, #tpu.memory_space<vmem>>, vector<4x16xf32>
    tpu.vector_store %arg13[%c4_44, %c0_45], %66 {strides = array<i32>} : memref<8x16xf32, #tpu.memory_space<vmem>>, vector<4x16xf32>,
    %68 = vector.extract_strided_slice %57 {offsets = [0, 16], sizes = [8, 16], strides = [1, 1]} : vector<8x32xf32> to vector<8x16xf32>
    %cst_46 = arith.constant dense<0.000000e+00> : vector<4x16xf32>
    %69 = tpu.matmul %7, %68, %cst_46 {dimension_numbers = #tpu.dot_dimension_numbers<[1], [0], [0], [1], [0, 0, 1, 1], [], []>, precision = #tpu.contract_precision<fp32>} : vector<4x8xf32>, vector<8x16xf32>, vector<4x16xf32> -> vector<4x16xf32>
    %70 = vector.broadcast %8 : vector<4x1xf32> to vector<4x16xf32>
    %71 = arith.addf %69, %70 : vector<4x16xf32>
    %72 = arith.negf %71 : vector<4x16xf32>
    %73 = math.exp %72 : vector<4x16xf32>
    %cst_47 = arith.constant 1.000000e+00 : f32
    %74 = vector.broadcast %cst_47 : f32 to vector<4x16xf32>
    %75 = arith.addf %74, %73 : vector<4x16xf32>
    %76 = arith.divf %74, %75 : vector<4x16xf32>
    %c4_48 = arith.constant 4 : index
    %c0_49 = arith.constant 0 : index
    %77 = vector.load %arg14[%c4_48, %c0_49] : memref<8x16xf32, #tpu.memory_space<vmem>>, vector<4x16xf32>
    tpu.vector_store %arg14[%c4_48, %c0_49], %76 {strides = array<i32>} : memref<8x16xf32, #tpu.memory_space<vmem>>, vector<4x16xf32>,
    %c0_50 = arith.constant 0 : index
    %c0_51 = arith.constant 0 : index
    %78 = vector.load %arg13[%c0_50, %c0_51] : memref<8x16xf32, #tpu.memory_space<vmem>>, vector<8x16xf32>
    %c0_52 = arith.constant 0 : index
    %c0_53 = arith.constant 0 : index
    %79 = vector.load %arg14[%c0_52, %c0_53] : memref<8x16xf32, #tpu.memory_space<vmem>>, vector<8x16xf32>
    %cst_54 = arith.constant dense<0.000000e+00> : vector<8x256xf32>
    %80 = tpu.matmul %78, %1, %cst_54 {dimension_numbers = #tpu.dot_dimension_numbers<[1], [0], [0], [1], [0, 0, 1, 1], [], []>} : vector<8x16xf32>, vector<16x256xf32>, vector<8x256xf32> -> vector<8x256xf32>
    %cst_55 = arith.constant dense<0.000000e+00> : vector<8x256xf32>
    %81 = tpu.matmul %79, %2, %cst_55 {dimension_numbers = #tpu.dot_dimension_numbers<[1], [0], [0], [1], [0, 0, 1, 1], [], []>} : vector<8x16xf32>, vector<16x256xf32>, vector<8x256xf32> -> vector<8x256xf32>
    %c0_56 = arith.constant 0 : index
    %c0_57 = arith.constant 0 : index
    %82 = vector.load %arg1[%c0_56, %c0_57] : memref<8x256xf32, #tpu.memory_space<vmem>>, vector<8x256xf32>
    %83 = arith.mulf %80, %81 : vector<8x256xf32>
    %84 = arith.mulf %82, %83 : vector<8x256xf32>
    %c0_58 = arith.constant 0 : index
    %c0_59 = arith.constant 0 : index
    %85 = vector.load %arg11[%c0_58, %c0_59] : memref<8x256xf32, #tpu.memory_space<vmem>>, vector<8x256xf32>
    tpu.vector_store %arg11[%c0_58, %c0_59], %84 {strides = array<i32>} : memref<8x256xf32, #tpu.memory_space<vmem>>, vector<8x256xf32>,
    return
  }
  func.func @transform_0(%arg0: i32) -> (i32, i32) {
    %c0_i32 = arith.constant 0 : i32
    %c0_i32_0 = arith.constant 0 : i32
    return %arg0, %c0_i32 : i32, i32
  }
  func.func @transform_1(%arg0: i32) -> (i32, i32) {
    %c0_i32 = arith.constant 0 : i32
    %c0_i32_0 = arith.constant 0 : i32
    %c0_i32_1 = arith.constant 0 : i32
    return %c0_i32, %c0_i32_0 : i32, i32
  }
  func.func @transform_2(%arg0: i32) -> (i32, i32) {
    %c0_i32 = arith.constant 0 : i32
    %c0_i32_0 = arith.constant 0 : i32
    %c0_i32_1 = arith.constant 0 : i32
    return %c0_i32, %c0_i32_0 : i32, i32
  }
  func.func @transform_3(%arg0: i32) -> (i32, i32) {
    %c0_i32 = arith.constant 0 : i32
    %c0_i32_0 = arith.constant 0 : i32
    %c0_i32_1 = arith.constant 0 : i32
    return %c0_i32, %c0_i32_0 : i32, i32
  }
  func.func @transform_4(%arg0: i32) -> (i32, i32) {
    %c0_i32 = arith.constant 0 : i32
    %c0_i32_0 = arith.constant 0 : i32
    %c0_i32_1 = arith.constant 0 : i32
    return %c0_i32, %c0_i32_0 : i32, i32
  }
  func.func @transform_5(%arg0: i32) -> (i32, i32) {
    %c0_i32 = arith.constant 0 : i32
    %c0_i32_0 = arith.constant 0 : i32
    %c0_i32_1 = arith.constant 0 : i32
    return %c0_i32, %c0_i32_0 : i32, i32
  }
  func.func @transform_6(%arg0: i32) -> (i32, i32) {
    %c0_i32 = arith.constant 0 : i32
    %c0_i32_0 = arith.constant 0 : i32
    %c0_i32_1 = arith.constant 0 : i32
    return %c0_i32, %c0_i32_0 : i32, i32
  }
  func.func @transform_7(%arg0: i32) -> (i32, i32) {
    %c0_i32 = arith.constant 0 : i32
    %c0_i32_0 = arith.constant 0 : i32
    %c0_i32_1 = arith.constant 0 : i32
    return %c0_i32, %c0_i32_0 : i32, i32
  }
  func.func @transform_8(%arg0: i32) -> (i32, i32) {
    %c0_i32 = arith.constant 0 : i32
    %c0_i32_0 = arith.constant 0 : i32
    %c0_i32_1 = arith.constant 0 : i32
    return %c0_i32, %c0_i32_0 : i32, i32
  }
  func.func @transform_9(%arg0: i32) -> (i32, i32) {
    %c0_i32 = arith.constant 0 : i32
    %c0_i32_0 = arith.constant 0 : i32
    %c0_i32_1 = arith.constant 0 : i32
    return %c0_i32, %c0_i32_0 : i32, i32
  }
  func.func @transform_10(%arg0: i32) -> (i32, i32) {
    %c0_i32 = arith.constant 0 : i32
    %c0_i32_0 = arith.constant 0 : i32
    return %arg0, %c0_i32 : i32, i32
  }
}

</mosaic_0001>

<bundles_post_ra>
// kernel: tpu_custom_call.1
= control target key start
LH: loop header
LB: loop body
LE: loop exit
PB: predicated region body
PF: predicated region fallthrough
CT: control target
= control target key end

     0   :  { %s3860_s0 = inlined_call_operand.vmem [shape: f32[8,256], index: 0, kind: input, shape index: {}]   ;;  %s3861_s1 = inlined_call_operand.vmem [shape: f32[256,32], index: 1, kind: input, shape index: {}]   ;;  %s3862_s2 = inlined_call_operand.vmem [shape: f32[16,256], index: 2, kind: input, shape index: {}]   ;;  %s3863_s3 = inlined_call_operand.vmem [shape: f32[16,256], index: 3, kind: input, shape index: {}]   ;;  %s3864_s4 = inlined_call_operand.vmem [shape: f32[8,4], index: 4, kind: input, shape index: {}]   ;;  %s3865_s5 = inlined_call_operand.vmem [shape: f32[8,1], index: 5, kind: input, shape index: {}]   ;;  %s3866_s6 = inlined_call_operand.vmem [shape: f32[4,8], index: 6, kind: input, shape index: {}]   ;;  %s3867_s7 = inlined_call_operand.vmem [shape: f32[4,1], index: 7, kind: input, shape index: {}]   ;;  %s3868_s8 = inlined_call_operand.vmem [shape: f32[4,8], index: 8, kind: input, shape index: {}]   ;;  %s3869_s9 = inlined_call_operand.vmem [shape: f32[4,1], index: 9, kind: input, shape index: {}]   ;;  %s3870_s10 = inlined_call_operand.hbm [shape: f32[8,256], index: 10, kind: output, shape index: {}]  }
   0x1   :  { %v67_v0 = vld [vmem:[%s3861_s1 + $0xf8] sm:$0xff]  ;;  %v66_v2 = vld [vmem:[%s3861_s1 + $0xf0] sm:$0xff]  ;;  %v65_v4 = vld [vmem:[%s3861_s1 + $0xe8] sm:$0xff] }
   0x2   :  { %v51_v1 = vld [vmem:[%s3861_s1 + $0x78] sm:$0xff]  ;;  %3093 = vmatprep.subr.mxu0 %v67_v0  ;;  %v50_v3 = vld [vmem:[%s3861_s1 + $0x70] sm:$0xff]  ;;  %v49_v5 = vld [vmem:[%s3861_s1 + $0x68] sm:$0xff] }
   0x3   :  { %3094 = vmatpush3.msra.mxu0 %v51_v1  ;;  %v64_v6 = vld [vmem:[%s3861_s1 + $0xe0] sm:$0xff]  ;;  %v63_v8 = vld [vmem:[%s3861_s1 + $0xd8] sm:$0xff]  ;;  %v62_v10 = vld [vmem:[%s3861_s1 + $0xd0] sm:$0xff] }
   0x4   :  { %3095 = vmatprep.subr.mxu0 %v66_v2  ;;  %v48_v7 = vld [vmem:[%s3861_s1 + $0x60] sm:$0xff]  ;;  %v47_v9 = vld [vmem:[%s3861_s1 + $0x58] sm:$0xff]  ;;  %v46_v11 = vld [vmem:[%s3861_s1 + $0x50] sm:$0xff] }
   0x5   :  { %3096 = vmatpush3.msra.mxu0 %v50_v3  ;;  %v61_v12 = vld [vmem:[%s3861_s1 + $0xc8] sm:$0xff] }
   0x6   :  { %3097 = vmatprep.subr.mxu0 %v65_v4  ;;  %v3527_v13 = vld [vmem:[%s3860_s0 + $0x8] sm:$0xff] }
   0x7   :  { %3098 = vmatpush3.msra.mxu0 %v49_v5  ;;  %v45_v14 = vld [vmem:[%s3861_s1 + $0x48] sm:$0xff]  ;;  %148 = vmatprep.mubr.f32.mxu0 %v3527_v13 }
   0x8   :  { %3099 = vmatprep.subr.mxu0 %v64_v6 }
   0x9   :  { %3100 = vmatpush3.msra.mxu0 %v48_v7 }
   0xa   :  { %3101 = vmatprep.subr.mxu0 %v63_v8 }
   0xb   :  { %3102 = vmatpush3.msra.mxu0 %v47_v9 }
   0xc   :  { %3103 = vmatprep.subr.mxu0 %v62_v10 }
   0xd   :  { %15 = vsyncpa [#allocation6], 0  ;;  %3104 = vmatpush3.msra.mxu0 %v46_v11  ;;  %v60_v15 = vld [vmem:[%s3861_s1 + $0xc0] sm:$0xff]  ;;  %v59_v17 = vld [vmem:[%s3861_s1 + $0xb8] sm:$0xff]  ;;  %v3425_v34 = vmov 0.0   ;;  %vm3426_vm0 = vmmov 0  }
   0xe   :  { %3105 = vmatprep.subr.mxu0 %v61_v12  ;;  %v44_v16 = vld [vmem:[%s3861_s1 + $0x40] sm:$0xff]  ;;  %v43_v18 = vld [vmem:[%s3861_s1 + $0x38] sm:$0xff]  ;;  %v58_v19 = vld [vmem:[%s3861_s1 + $0xb0] sm:$0xff]  ;;  %3200 = vmatprep.subr.mxu1 %v3425_v34  ;;  %v3427_v36 = vmov 0   ;;  %vm162_vm1 = vcmask 31744   ;;  %vm154_vm2 = vcmask 261120  }
   0xf   :  { %3106 = vmatpush3.msra.mxu0 %v45_v14  ;;  %v42_v20 = vld [vmem:[%s3861_s1 + $0x30] sm:$0xff]  ;;  %v57_v21 = vld [vmem:[%s3861_s1 + $0xa8] sm:$0xff]  ;;  %v56_v23 = vld [vmem:[%s3861_s1 + $0xa0] sm:$0xff]  ;;  %3202 = vmatprep.mubr.msk.f32.mxu1 %vm3426_vm0, %v3425_v34  ;;  %vm166_vm3 = vcmask 1043456   ;;  %vm626_vm4 = vcmask 64512   ;;  %vm1082_vm5 = vcmask 125952  }
  0x10   :  { %3107 = vmatprep.subr.mxu0 %v60_v15  ;;  %v41_v22 = vld [vmem:[%s3861_s1 + $0x28] sm:$0xff]  ;;  %v40_v24 = vld [vmem:[%s3861_s1 + $0x20] sm:$0xff]  ;;  %v55_v25 = vld [vmem:[%s3861_s1 + $0x98] sm:$0xff]  ;;  %3385 = vset.pattern.permute.xlu0 %v3427_v36  ;;  %vm2916_vm6 = vcmask 130048  }
  0x11   :  { %3108 = vmatpush3.msra.mxu0 %v44_v16  ;;  %v39_v26 = vld [vmem:[%s3861_s1 + $0x18] sm:$0xff]  ;;  %v54_v27 = vld [vmem:[%s3861_s1 + $0x90] sm:$0xff]  ;;  %v53_v29 = vld [vmem:[%s3861_s1 + $0x88] sm:$0xff]  ;;  %3386 = vset.pattern.permute.xlu1 %v3427_v36 }
  0x12   :  { %3109 = vmatprep.subr.mxu0 %v59_v17  ;;  %v38_v28 = vld [vmem:[%s3861_s1 + $0x10] sm:$0xff]  ;;  %v37_v30 = vld [vmem:[%s3861_s1 + $0x8] sm:$0xff]  ;;  %v52_v31 = vld [vmem:[%s3861_s1 + $0x80] sm:$0xff] }
  0x13   :  { %3110 = vmatpush3.msra.mxu0 %v43_v18  ;;  %v36_v32 = vld [vmem:[%s3861_s1] sm:$0xff] }
  0x14   :  { %3111 = vmatprep.subr.mxu0 %v58_v19  ;;  %v3590_v33 = vld [vmem:[%s3860_s0] sm:$0xff] }
  0x15   :  { %3112 = vmatpush3.msra.mxu0 %v42_v20  ;;  %v77_v35 = vld [vmem:[%s3865_s5] sm:$0xff] }
  0x16   :  { %3113 = vmatprep.subr.mxu0 %v57_v21  ;;  %159 = vperm.xlu0 %3385, %v77_v35   ;;  %v76_v37 = vld [vmem:[%s3864_s4] sm:$0xff] }
  0x17   :  { %3114 = vmatpush3.msra.mxu0 %v41_v22  ;;  %v164_v38 = vsel %vm162_vm1, %v76_v37, 0  ;;  %v78_v63 = vld [vmem:[%s3866_s6] sm:$0xf]  ;;  %s3428_s6 = smov 112  }
  0x18   :  { %3115 = vmatprep.subr.mxu0 %v56_v23  ;;  %v3605_v39 = vand.u32 4294901760, %v164_v38  ;;  %v628_v3 = vsel %vm626_vm4, %v78_v63, 0  ;;  %v81_v22 = vld [vmem:[%s3869_s9] sm:$0xf] }
  0x19   :  { %3116 = vmatpush3.msra.mxu0 %v40_v24  ;;  %v3649_v7 = vand.u32 4294901760, %v628_v3 }
  0x1a   :  { %3117 = vmatprep.subr.mxu0 %v55_v25  ;;  %v3608_v41 = vsub.f32 %v164_v38, %v3605_v39 }
  0x1b   :  { %3118 = vmatpush3.msra.mxu0 %v39_v26  ;;  %v3652_v12 = vsub.f32 %v628_v3, %v3649_v7 }
  0x1c   :  { %3119 = vmatprep.subr.mxu0 %v54_v27  ;;  %v3611_v44 = vand.u32 4294901760, %v3608_v41 }
  0x1d   :  { %3120 = vmatpush3.msra.mxu0 %v38_v28  ;;  %v3655_v16 = vand.u32 4294901760, %v3652_v12  ;;  %v80_v28 = vld [vmem:[%s3868_s8] sm:$0xf] }
  0x1e   :  { %3121 = vmatprep.subr.mxu0 %v53_v29  ;;  %v239_v45 = vsub.f32 %v3608_v41, %v3611_v44  ;;  %v1094_v29 = vsel %vm626_vm4, %v80_v28, 0 }
  0x1f   :  { %3122 = vmatpush3.msra.mxu0 %v37_v30  ;;  %v699_v19 = vsub.f32 %v3652_v12, %v3655_v16  ;;  %v3693_v30 = vand.u32 4294901760, %v1094_v29 }
  0x20   :  { %3123 = vmatprep.subr.mxu0 %v52_v31  ;;  %v3616_v48 = vand.u32 4294901760, %v239_v45 }
  0x21   :  { %3124 = vmatpush3.msra.mxu0 %v36_v32  ;;  %v3663_v23 = vand.u32 4294901760, %v699_v19  ;;  %v3696_v31 = vsub.f32 %v1094_v29, %v3693_v30 }
  0x22   :  { %149 = vmatmul.mubr.f32.vlgmr.msra.gmra.mxu0 %v3590_v33  ;;  %3245 = vmatprep.subr.mxu0 %v3425_v34 }
  0x23   :  { %3247 = vmatprep.mubr.msk.f32.mxu0 %vm3426_vm0, %v3425_v34  ;;  %v3699_v32 = vand.u32 4294901760, %v3696_v31 }
  0x25   :  { %v1165_v35 = vsub.f32 %v3696_v31, %v3699_v32 }
  0x27   :  { %v3703_v38 = vand.u32 4294901760, %v1165_v35 }
  0x91   :  { %v3642_v58 = vpop.permute.xlu0 %159 }
  0xe2   :  { %v3125_v40 = vpop.f32.mrf.mxu0 }
  0xe4   :  { %v3126_v42 = vpop.f32.mrf.mxu0 }
  0xe5   :  { %v3127_v43 = vadd.f32 %v3126_v42, %v3125_v40 }
  0xe7   :  { %155 = vst.msk [vmem:[#allocation2] sm:$0xff] %vm154_vm2, %v3127_v43 }
  0xee   :  { %v156_v46 = vld [vmem:[#allocation2] sm:$0xf]  ;;  %v1549_v36 = vld [vmem:[#allocation2 + $0x4] sm:$0xf] }
  0xef   :  { %v168_v47 = vsel %vm166_vm3, %v156_v46, 0  ;;  %v1551_v40 = vsel %vm166_vm3, %v1549_v36, 0 }
  0xf0   :  { %v201_v49 = vand.u32 4294901760, %v168_v47  ;;  %v1584_v45 = vand.u32 4294901760, %v1551_v40 }
  0xf2   :  { %3201 = vmatpush3.msra.mxu1 %v201_v49  ;;  %v278_v50 = vsub.f32 %v168_v47, %v201_v49 }
  0xf3   :  { %3203 = vmatmul.mubr.f32.vlgmr.msra.gmra.mxu1 %v3616_v48  ;;  %3205 = vmatprep.subr.mxu1 %v3425_v34 }
  0xf4   :  { %v279_v51 = vand.u32 4294901760, %v278_v50  ;;  %3207 = vmatprep.mubr.msk.f32.mxu1 %vm3426_vm0, %v3425_v34 }
  0xf6   :  { %v280_v52 = vsub.f32 %v278_v50, %v279_v51 }
  0xf8   :  { %v281_v53 = vand.u32 4294901760, %v280_v52 }
  0xfa   :  { %3206 = vmatpush3.msra.mxu1 %v281_v53 }
  0xfb   :  { %3208 = vmatmul.mubr.f32.vlgmr.msra.gmra.mxu1 %v3605_v39  ;;  %3210 = vmatprep.subr.mxu1 %v3425_v34 }
  0xfc   :  { %3211 = vmatpush3.msra.mxu1 %v278_v50  ;;  %3212 = vmatprep.mubr.msk.f32.mxu1 %vm3426_vm0, %v3425_v34 }
  0xfd   :  { %3215 = vmatprep.subr.mxu1 %v3425_v34 }
  0xff   :  { %3213 = vmatmul.mubr.f32.vlgmr.msra.gmra.mxu1 %v3608_v41 }
 0x100   :  { %3216 = vmatpush3.msra.mxu1 %v201_v49  ;;  %3217 = vmatprep.mubr.msk.f32.mxu1 %vm3426_vm0, %v3425_v34 }
 0x101   :  { %3220 = vmatprep.subr.mxu1 %v3425_v34 }
 0x103   :  { %3218 = vmatmul.mubr.f32.vlgmr.msra.gmra.mxu1 %v3611_v44 }
 0x104   :  { %3221 = vmatpush3.msra.mxu1 %v279_v51  ;;  %3222 = vmatprep.mubr.msk.f32.mxu1 %vm3426_vm0, %v3425_v34 }
 0x105   :  { %3225 = vmatprep.subr.mxu1 %v3425_v34 }
 0x107   :  { %3223 = vmatmul.mubr.f32.vlgmr.msra.gmra.mxu1 %v3605_v39 }
 0x108   :  { %3226 = vmatpush3.msra.mxu1 %v201_v49  ;;  %3227 = vmatprep.mubr.msk.f32.mxu1 %vm3426_vm0, %v3425_v34  ;;  %v1661_v49 = vsub.f32 %v1551_v40, %v1584_v45 }
 0x109   :  { %3230 = vmatprep.subr.mxu1 %v3425_v34 }
 0x10a   :  { %v1662_v51 = vand.u32 4294901760, %v1661_v49 }
 0x10b   :  { %3228 = vmatmul.mubr.f32.vlgmr.msra.gmra.mxu1 %v3605_v39 }
 0x10c   :  { %3232 = vmatprep.mubr.msk.f32.mxu1 %vm3426_vm0, %v3425_v34  ;;  %v1663_v52 = vsub.f32 %v1661_v49, %v1662_v51 }
 0x10e   :  { %v1664_v53 = vand.u32 4294901760, %v1663_v52 }
 0x1b3   :  { %v242_v54 = vpop.f32.mrf.mxu1 }
 0x1b4   :  { %v243_v61 = vadd.f32 %v242_v54, %v3642_v58 }
 0x1b5   :  { %v3204_v55 = vpop.f32.mrf.mxu1 }
 0x1bb   :  { %v318_v56 = vpop.f32.mrf.mxu1 }
 0x1bc   :  { %v319_v0 = vadd.f32 %v318_v56, %v243_v61 }
 0x1bd   :  { %v3209_v57 = vpop.f32.mrf.mxu1 }
 0x1bf   :  { %v392_v59 = vpop.f32.mrf.mxu1 }
 0x1c0   :  { %v393_v2 = vadd.f32 %v392_v59, %v319_v0 }
 0x1c1   :  { %v3214_v60 = vpop.f32.mrf.mxu1 }
 0x1c3   :  { %v466_v62 = vpop.f32.mrf.mxu1 }
 0x1c4   :  { %v467_v5 = vadd.f32 %v466_v62, %v393_v2 }
 0x1c5   :  { %v3219_v1 = vpop.f32.mrf.mxu1 }
 0x1c7   :  { %v540_v4 = vpop.f32.mrf.mxu1 }
 0x1c8   :  { %v541_v8 = vadd.f32 %v540_v4, %v467_v5 }
 0x1c9   :  { %v3224_v6 = vpop.f32.mrf.mxu1 }
 0x1cb   :  { %v612_v9 = vpop.f32.mrf.mxu1 }
 0x1cc   :  { %v613_v10 = vadd.f32 %v612_v9, %v541_v8 }
 0x1cd   :  { %v3229_v11 = vpop.f32.mrf.mxu1 }
 0x1ce   :  { %v616_v14 = vadd.f32 3.0, %v613_v10 }
 0x1d0   :  { %v617_v15 = vmax.f32 %v616_v14, 0.0 }
 0x1d2   :  { %v618_v17 = vmin.f32 %v617_v15, 6.0 }
 0x1d4   :  { %v619_v18 = vmul.f32 0.16666667, %v618_v17 }
 0x1d6   :  { %v620_v20 = vmul.f32 %v619_v18, %v613_v10 }
 0x1d8   :  { %v661_v21 = vand.u32 4294901760, %v620_v20  ;;  %1090 = vrot.lane.b32.xlu0 %v620_v20, %s3428_s6 }
 0x1da   :  { %v738_v24 = vsub.f32 %v620_v20, %v661_v21  ;;  %3231 = vmatpush3.msra.mxu1 %v661_v21  ;;  %3246 = vmatpush3.msra.mxu0 %v661_v21 }
 0x1db   :  { %3255 = vmatprep.subr.mxu0 %v3425_v34  ;;  %3248 = vmatmul.mubr.f32.vlgmr.msra.gmra.mxu0 %v3655_v16 }
 0x1dc   :  { %1086 = vperm.xlu0 %3385, %v81_v22   ;;  %3256 = vmatpush3.msra.mxu0 %v661_v21  ;;  %v739_v25 = vand.u32 4294901760, %v738_v24 }
 0x1dd   :  { %3233 = vmatmul.mubr.f32.vlgmr.msra.gmra.mxu1 %v3663_v23  ;;  %3235 = vmatprep.subr.mxu1 %v3425_v34 }
 0x1de   :  { %v740_v26 = vsub.f32 %v738_v24, %v739_v25  ;;  %3237 = vmatprep.mubr.msk.f32.mxu1 %vm3426_vm0, %v3425_v34  ;;  %3257 = vmatprep.mubr.msk.f32.mxu0 %vm3426_vm0, %v3425_v34 }
 0x1df   :  { %3258 = vmatmul.mubr.f32.vlgmr.msra.gmra.mxu0 %v3649_v7  ;;  %3265 = vmatprep.subr.mxu0 %v3425_v34 }
 0x1e0   :  { %v741_v27 = vand.u32 4294901760, %v740_v26  ;;  %3267 = vmatprep.mubr.msk.f32.mxu0 %vm3426_vm0, %v3425_v34 }
 0x1e2   :  { %3236 = vmatpush3.msra.mxu1 %v741_v27 }
 0x1e3   :  { %3238 = vmatmul.mubr.f32.vlgmr.msra.gmra.mxu1 %v3649_v7  ;;  %3240 = vmatprep.subr.mxu1 %v3425_v34 }
 0x1e4   :  { %3241 = vmatpush3.msra.mxu1 %v738_v24  ;;  %3242 = vmatprep.mubr.msk.f32.mxu1 %vm3426_vm0, %v3425_v34 }
 0x1e5   :  { %3250 = vmatprep.subr.mxu1 %v3425_v34 }
 0x1e7   :  { %3243 = vmatmul.mubr.f32.vlgmr.msra.gmra.mxu1 %v3652_v12 }
 0x1e8   :  { %3251 = vmatpush3.msra.mxu1 %v739_v25  ;;  %3252 = vmatprep.mubr.msk.f32.mxu1 %vm3426_vm0, %v3425_v34 }
 0x1e9   :  { %3260 = vmatprep.subr.mxu1 %v3425_v34 }
 0x1eb   :  { %3253 = vmatmul.mubr.f32.vlgmr.msra.gmra.mxu1 %v3649_v7 }
 0x1ec   :  { %3262 = vmatprep.mubr.msk.f32.mxu1 %vm3426_vm0, %v3425_v34 }
 0x24a   :  { %v1091_v37 = vpop.permute.xlu0 %1090 }
 0x24b   :  { %v1127_v42 = vand.u32 4294901760, %v1091_v37 }
 0x24d   :  { %v1204_v43 = vsub.f32 %v1091_v37, %v1127_v42  ;;  %3261 = vmatpush3.msra.mxu1 %v1127_v42 }
 0x24e   :  { %3263 = vmatmul.mubr.f32.vlgmr.msra.gmra.mxu1 %v3703_v38  ;;  %3270 = vmatprep.subr.mxu1 %v3425_v34 }
 0x24f   :  { %v1205_v46 = vand.u32 4294901760, %v1204_v43  ;;  %3271 = vmatpush3.msra.mxu1 %v1204_v43  ;;  %3272 = vmatprep.mubr.msk.f32.mxu1 %vm3426_vm0, %v3425_v34 }
 0x250   :  { %3280 = vmatprep.subr.mxu1 %v3425_v34 }
 0x251   :  { %v1206_v47 = vsub.f32 %v1204_v43, %v1205_v46 }
 0x252   :  { %3273 = vmatmul.mubr.f32.vlgmr.msra.gmra.mxu1 %v3696_v31 }
 0x253   :  { %v1207_v50 = vand.u32 4294901760, %v1206_v47  ;;  %3281 = vmatpush3.msra.mxu1 %v1205_v46  ;;  %3282 = vmatprep.mubr.msk.f32.mxu1 %vm3426_vm0, %v3425_v34 }
 0x254   :  { %3290 = vmatprep.subr.mxu1 %v3425_v34 }
 0x255   :  { %3266 = vmatpush3.msra.mxu0 %v1207_v50 }
 0x256   :  { %3268 = vmatmul.mubr.f32.vlgmr.msra.gmra.mxu0 %v3693_v30  ;;  %3275 = vmatprep.subr.mxu0 %v3425_v34 }
 0x257   :  { %3283 = vmatmul.mubr.f32.vlgmr.msra.gmra.mxu1 %v3693_v30  ;;  %3276 = vmatpush3.msra.mxu0 %v1127_v42  ;;  %v3766_v2 = vpop.permute.xlu0 %1086 }
 0x258   :  { %3291 = vmatpush3.msra.mxu1 %v1584_v45  ;;  %3277 = vmatprep.mubr.msk.f32.mxu0 %vm3426_vm0, %v3425_v34 }
 0x259   :  { %3285 = vmatprep.subr.mxu0 %v3425_v34  ;;  %3292 = vmatprep.mubr.msk.f32.mxu1 %vm3426_vm0, %v3425_v34 }
 0x25a   :  { %3300 = vmatprep.subr.mxu1 %v3425_v34  ;;  %3278 = vmatmul.mubr.f32.vlgmr.msra.gmra.mxu0 %v3699_v32 }
 0x25b   :  { %3286 = vmatpush3.msra.mxu0 %v1127_v42  ;;  %3293 = vmatmul.mubr.f32.vlgmr.msra.gmra.mxu1 %v3616_v48 }
 0x25c   :  { %3301 = vmatpush3.msra.mxu1 %v1661_v49  ;;  %3287 = vmatprep.mubr.msk.f32.mxu0 %vm3426_vm0, %v3425_v34 }
 0x25d   :  { %3295 = vmatprep.subr.mxu0 %v3425_v34  ;;  %3302 = vmatprep.mubr.msk.f32.mxu1 %vm3426_vm0, %v3425_v34 }
 0x25e   :  { %3310 = vmatprep.subr.mxu1 %v3425_v34  ;;  %3288 = vmatmul.mubr.f32.vlgmr.msra.gmra.mxu0 %v3693_v30 }
 0x25f   :  { %3296 = vmatpush3.msra.mxu0 %v1664_v53  ;;  %3303 = vmatmul.mubr.f32.vlgmr.msra.gmra.mxu1 %v3608_v41 }
 0x260   :  { %3311 = vmatpush3.msra.mxu1 %v1662_v51  ;;  %3297 = vmatprep.mubr.msk.f32.mxu0 %vm3426_vm0, %v3425_v34 }
 0x261   :  { %3305 = vmatprep.subr.mxu0 %v3425_v34  ;;  %3312 = vmatprep.mubr.msk.f32.mxu1 %vm3426_vm0, %v3425_v34 }
 0x262   :  { %3298 = vmatmul.mubr.f32.vlgmr.msra.gmra.mxu0 %v3605_v39  ;;  %3320 = vmatprep.subr.mxu1 %v3425_v34 }
 0x263   :  { %3306 = vmatpush3.msra.mxu0 %v1584_v45  ;;  %3307 = vmatprep.mubr.msk.f32.mxu0 %vm3426_vm0, %v3425_v34 }
 0x264   :  { %3315 = vmatprep.subr.mxu0 %v3425_v34  ;;  %3313 = vmatmul.mubr.f32.vlgmr.msra.gmra.mxu1 %v3605_v39 }
 0x265   :  { %3322 = vmatprep.mubr.msk.f32.mxu1 %vm3426_vm0, %v3425_v34 }
 0x266   :  { %3308 = vmatmul.mubr.f32.vlgmr.msra.gmra.mxu0 %v3611_v44 }
 0x267   :  { %3316 = vmatpush3.msra.mxu0 %v1584_v45  ;;  %3317 = vmatprep.mubr.msk.f32.mxu0 %vm3426_vm0, %v3425_v34 }
 0x268   :  { %3325 = vmatprep.subr.mxu0 %v3425_v34 }
 0x26a   :  { %3318 = vmatmul.mubr.f32.vlgmr.msra.gmra.mxu0 %v3605_v39 }
 0x26b   :  { %3327 = vmatprep.mubr.msk.f32.mxu0 %vm3426_vm0, %v3425_v34 }
 0x29b   :  { %v3754_v41 = vpop.f32.mrf.mxu0 }
 0x29d   :  { %v3756_v48 = vpop.f32.mrf.mxu1  ;;  %v3249_v54 = vpop.f32.mrf.mxu0 }
 0x29f   :  { %v3234_v55 = vpop.f32.mrf.mxu1  ;;  %v3758_v56 = vpop.f32.mrf.mxu0 }
 0x2a1   :  { %v3259_v44 = vpop.f32.mrf.mxu0 }
 0x2a3   :  { %v3760_v57 = vpop.f32.mrf.mxu1 }
 0x2a5   :  { %v3239_v59 = vpop.f32.mrf.mxu1 }
 0x2a7   :  { %v3762_v60 = vpop.f32.mrf.mxu1 }
 0x2a9   :  { %v3244_v61 = vpop.f32.mrf.mxu1 }
 0x2ab   :  { %v3764_v62 = vpop.f32.mrf.mxu1 }
 0x2ad   :  { %v3254_v39 = vpop.f32.mrf.mxu1 }
 0x2ae   :  { %v79_v39 = vld [vmem:[%s3867_s7] sm:$0xf] }
 0x30e   :  { %v1168_v63 = vpop.f32.mrf.mxu1 }
 0x30f   :  { %v1169_v4 = vadd.f32 %v1168_v63, %v3766_v2 }
 0x310   :  { %v3264_v0 = vpop.f32.mrf.mxu1 }
 0x312   :  { %v1318_v1 = vpop.f32.mrf.mxu1 }
 0x314   :  { %v3274_v3 = vpop.f32.mrf.mxu1 }
 0x316   :  { %v1244_v5 = vpop.f32.mrf.mxu0 }
 0x317   :  { %v1245_v6 = vadd.f32 %v1244_v5, %v1169_v4  ;;  %v1466_v8 = vpop.f32.mrf.mxu1 }
 0x318   :  { %v3269_v9 = vpop.f32.mrf.mxu0 }
 0x319   :  { %v3284_v10 = vpop.f32.mrf.mxu1  ;;  %v1319_v11 = vadd.f32 %v1318_v1, %v1245_v6 }
 0x31a   :  { %v1392_v14 = vpop.f32.mrf.mxu0 }
 0x31b   :  { %v1393_v15 = vadd.f32 %v1392_v14, %v1319_v11  ;;  %v1625_v17 = vpop.f32.mrf.mxu1  ;;  %v68_v11 = vld [vmem:[%s3862_s2] sm:$0xff] }
 0x31c   :  { %v3279_v18 = vpop.f32.mrf.mxu0  ;;  %v1626_v26 = vadd.f32 %v1625_v17, %v3642_v58 }
 0x31d   :  { %v1467_v19 = vadd.f32 %v1466_v8, %v1393_v15  ;;  %v3294_v20 = vpop.f32.mrf.mxu1 }
 0x31e   :  { %v1538_v21 = vpop.f32.mrf.mxu0 }
 0x31f   :  { %v1539_v22 = vadd.f32 %v1538_v21, %v1467_v19  ;;  %v1775_v24 = vpop.f32.mrf.mxu1 }
 0x320   :  { %v3289_v25 = vpop.f32.mrf.mxu0 }
 0x321   :  { %v3088_v27 = vmul.f32 -1.442695, %v1539_v22  ;;  %v3304_v28 = vpop.f32.mrf.mxu1 }
 0x322   :  { %v1701_v29 = vpop.f32.mrf.mxu0 }
 0x323   :  { %3387 = vpow2.f32 %v3088_v27  ;;  %v1702_v35 = vadd.f32 %v1701_v29, %v1626_v26 }
 0x324   :  { %v3299_v36 = vpop.f32.mrf.mxu0  ;;  %v1923_v37 = vpop.f32.mrf.mxu1 }
 0x325   :  { %v1776_v40 = vadd.f32 %v1775_v24, %v1702_v35 }
 0x326   :  { %v1849_v42 = vpop.f32.mrf.mxu0  ;;  %v3314_v43 = vpop.f32.mrf.mxu1 }
 0x327   :  { %v1850_v45 = vadd.f32 %v1849_v42, %v1776_v40 }
 0x328   :  { %v3309_v46 = vpop.f32.mrf.mxu0 }
 0x329   :  { %v1924_v47 = vadd.f32 %v1923_v37, %v1850_v45  ;;  %v75_v46 = vld [vmem:[%s3863_s3 + $0x18] sm:$0xff] }
 0x32a   :  { %v1995_v49 = vpop.f32.mrf.mxu0 }
 0x32b   :  { %v1996_v50 = vadd.f32 %v1995_v49, %v1924_v47  ;;  %v74_v47 = vld [vmem:[%s3863_s3 + $0x10] sm:$0xff]  ;;  %v73_v49 = vld [vmem:[%s3863_s3 + $0x8] sm:$0xff] }
 0x32c   :  { %v3319_v51 = vpop.f32.mrf.mxu0 }
 0x32d   :  { %v1999_v52 = vadd.f32 3.0, %v1996_v50 }
 0x32f   :  { %v2000_v53 = vmax.f32 %v1999_v52, 0.0 }
 0x330   :  { %v3388_v54 = vpop.eup %3387 }
 0x331   :  { %v1545_v58 = vadd.f32 1.0, %v3388_v54  ;;  %v2001_v55 = vmin.f32 %v2000_v53, 6.0 }
 0x333   :  { %3389 = vrcp.f32 %v1545_v58  ;;  %v2002_v44 = vmul.f32 0.16666667, %v2001_v55 }
 0x335   :  { %v2003_v59 = vmul.f32 %v2002_v44, %v1996_v50  ;;  %v72_v50 = vld [vmem:[%s3863_s3] sm:$0xff]  ;;  %s3429_s3 = smov [#allocation5]  }
 0x336   :  { %s3079_s1 = sshll.u32 %s3429_s3, 4  ;;  %s3080_s1 = int_to_ptr.vmem [resolvable:$true] %s3079_s1 }
 0x337   :  { %v2035_v61 = vand.u32 4294901760, %v2003_v59  ;;  %2458 = vrot.lane.b32.xlu1 %v2003_v59, %s3428_s6  ;;  %s3403_s21 = scalar_lea.vmem %s3080_s1, 256  ;;  %p3408_p1 = scmp.lt.s32.totalorder %s3080_s1, %s3080_s1 }
 0x338   :  { %p3404_p0 = scmp.ne.s32.totalorder %s3080_s1, %s3403_s21  ;;  %p3409_p2 = scmp.lt.s32.totalorder %s3403_s21, %s3403_s21 }
 0x339   :  { %v2112_v63 = vsub.f32 %v2003_v59, %v2035_v61  ;;  %3321 = vmatpush3.msra.mxu1 %v2035_v61 }
 0x33a   :  { %3323 = vmatmul.mubr.f32.vlgmr.msra.gmra.mxu1 %v3663_v23  ;;  %3330 = vmatprep.subr.mxu1 %v3425_v34  ;;  %p3410_p3 = por %p3409_p2, %p3408_p1 }
 0x33b   :  { %623 = vperm.xlu1 %3386, %v79_v39   ;;  %3331 = vmatpush3.msra.mxu1 %v2112_v63  ;;  %v2113_v0 = vand.u32 4294901760, %v2112_v63 }
 0x33c   :  { %3332 = vmatprep.mubr.msk.f32.mxu1 %vm3426_vm0, %v3425_v34  ;;  %3340 = vmatprep.subr.mxu1 %v3425_v34  ;;  %p3411_p4 = pnand %p3410_p3, %p3404_p0 }
 0x33d   :  { %v2114_v1 = vsub.f32 %v2112_v63, %v2113_v0 }
 0x33e   :  { %3333 = vmatmul.mubr.f32.vlgmr.msra.gmra.mxu1 %v3652_v12 }
 0x33f   :  { %3341 = vmatpush3.msra.mxu1 %v2113_v0  ;;  %v2115_v3 = vand.u32 4294901760, %v2114_v1  ;;  %3342 = vmatprep.mubr.msk.f32.mxu1 %vm3426_vm0, %v3425_v34 }
 0x340   :  { %v3390_v23 = vpop.eup %3389  ;;  %3350 = vmatprep.subr.mxu1 %v3425_v34 }
 0x341   :  { %1548 = vst.msk [vmem:[#allocation4] sm:$0xf] %vm1082_vm5, %v3390_v23  ;;  %3326 = vmatpush3.msra.mxu0 %v2115_v3 }
 0x342   :  { %3328 = vmatmul.mubr.f32.vlgmr.msra.gmra.mxu0 %v3649_v7  ;;  %3335 = vmatprep.subr.mxu0 %v3425_v34 }
 0x343   :  { %3336 = vmatpush3.msra.mxu0 %v2035_v61  ;;  %3337 = vmatprep.mubr.msk.f32.mxu0 %vm3426_vm0, %v3425_v34 }
 0x344   :  { %3345 = vmatprep.subr.mxu0 %v3425_v34  ;;  %3343 = vmatmul.mubr.f32.vlgmr.msra.gmra.mxu1 %v3649_v7 }
 0x345   :  { %3352 = vmatprep.mubr.msk.f32.mxu1 %vm3426_vm0, %v3425_v34 }
 0x346   :  { %3338 = vmatmul.mubr.f32.vlgmr.msra.gmra.mxu0 %v3655_v16 }
 0x347   :  { %3346 = vmatpush3.msra.mxu0 %v2035_v61  ;;  %3347 = vmatprep.mubr.msk.f32.mxu0 %vm3426_vm0, %v3425_v34 }
 0x348   :  { %3355 = vmatprep.subr.mxu0 %v3425_v34 }
 0x34a   :  { %3348 = vmatmul.mubr.f32.vlgmr.msra.gmra.mxu0 %v3649_v7  ;;  %v71_v7 = vld [vmem:[%s3862_s2 + $0x18] sm:$0xff] }
 0x34b   :  { %3357 = vmatprep.mubr.msk.f32.mxu0 %vm3426_vm0, %v3425_v34 }
 0x3a9   :  { %v2459_v12 = vpop.permute.xlu1 %2458 }
 0x3aa   :  { %v2492_v4 = vand.u32 4294901760, %v2459_v12 }
 0x3ac   :  { %v2569_v5 = vsub.f32 %v2459_v12, %v2492_v4  ;;  %3351 = vmatpush3.msra.mxu1 %v2492_v4 }
 0x3ad   :  { %3353 = vmatmul.mubr.f32.vlgmr.msra.gmra.mxu1 %v3703_v38  ;;  %3360 = vmatprep.subr.mxu1 %v3425_v34  ;;  %v70_v38 = vld [vmem:[%s3862_s2 + $0x10] sm:$0xff] }
 0x3ae   :  { %v2570_v16 = vand.u32 4294901760, %v2569_v5  ;;  %3361 = vmatpush3.msra.mxu1 %v2569_v5  ;;  %3362 = vmatprep.mubr.msk.f32.mxu1 %vm3426_vm0, %v3425_v34 }
 0x3af   :  { %3370 = vmatprep.subr.mxu1 %v3425_v34 }
 0x3b0   :  { %v2571_v6 = vsub.f32 %v2569_v5, %v2570_v16 }
 0x3b1   :  { %3363 = vmatmul.mubr.f32.vlgmr.msra.gmra.mxu1 %v3696_v31  ;;  %v69_v31 = vld [vmem:[%s3862_s2 + $0x8] sm:$0xff] }
 0x3b2   :  { %v2572_v8 = vand.u32 4294901760, %v2571_v6  ;;  %3371 = vmatpush3.msra.mxu1 %v2570_v16  ;;  %3372 = vmatprep.mubr.msk.f32.mxu1 %vm3426_vm0, %v3425_v34 }
 0x3b3   :  { %2948 = vmatprep.subr.mxu1 %v71_v7 }
 0x3b4   :  { %3356 = vmatpush3.msra.mxu0 %v2572_v8 }
 0x3b5   :  { %3358 = vmatmul.mubr.f32.vlgmr.msra.gmra.mxu0 %v3693_v30  ;;  %3365 = vmatprep.subr.mxu0 %v3425_v34 }
 0x3b6   :  { %v624_v9 = vpop.permute.xlu1 %623  ;;  %3366 = vmatpush3.msra.mxu0 %v2492_v4  ;;  %3367 = vmatprep.mubr.msk.f32.mxu0 %vm3426_vm0, %v3425_v34 }
 0x3b7   :  { %v703_v10 = vadd.f32 %v3756_v48, %v624_v9  ;;  %3375 = vmatprep.subr.mxu0 %v3425_v34  ;;  %3373 = vmatmul.mubr.f32.vlgmr.msra.gmra.mxu1 %v3693_v30 }
 0x3b8   :  { %2949 = vmatpush1.msra.mxu1 %v70_v38  ;;  %2984 = vmatprep.mubr.f32.mxu1 %v3425_v34 }
 0x3b9   :  { %v779_v14 = vadd.f32 %v3760_v57, %v703_v10  ;;  %3368 = vmatmul.mubr.f32.vlgmr.msra.gmra.mxu0 %v3699_v32  ;;  %2950 = vmatprep.subr.mxu1 %v69_v31 }
 0x3ba   :  { %3376 = vmatpush3.msra.mxu0 %v2492_v4  ;;  %3377 = vmatprep.mubr.msk.f32.mxu0 %vm3426_vm0, %v3425_v34 }
 0x3bb   :  { %v853_v48 = vadd.f32 %v3762_v60, %v779_v14  ;;  %2951 = vmatpush1.msra.mxu1 %v68_v11  ;;  %3022 = vmatprep.subr.mxu0 %v75_v46 }
 0x3bd   :  { %v927_v15 = vadd.f32 %v3754_v41, %v853_v48  ;;  %3378 = vmatmul.mubr.f32.vlgmr.msra.gmra.mxu0 %v3693_v30 }
 0x3be   :  { %3058 = vmatprep.mubr.f32.mxu0 %v3425_v34  ;;  %3023 = vmatpush1.msra.mxu0 %v74_v47 }
 0x3bf   :  { %v1001_v17 = vadd.f32 %v3764_v62, %v927_v15  ;;  %3024 = vmatprep.subr.mxu0 %v73_v49 }
 0x3c0   :  { %3025 = vmatpush1.msra.mxu0 %v72_v50 }
 0x3c1   :  { %v1073_v57 = vadd.f32 %v3758_v56, %v1001_v17 }
 0x3c3   :  { %v3087_v18 = vmul.f32 -1.442695, %v1073_v57 }
 0x3c5   :  { %3391 = vpow2.f32 %v3087_v18 }
 0x3d2   :  { %v3392_v32 = vpop.eup %3391 }
 0x3d3   :  { %v1079_v19 = vadd.f32 1.0, %v3392_v32 }
 0x3d5   :  { %3393 = vrcp.f32 %v1079_v19 }
 0x3e2   :  { %v3394_v20 = vpop.eup %3393 }
 0x3e3   :  { %1083 = vst.msk [vmem:[#allocation3] sm:$0xf] %vm1082_vm5, %v3394_v20 }
 0x3fa   :  { %v2076_v60 = vpop.f32.mrf.mxu1 }
 0x3fb   :  { %v2077_v41 = vadd.f32 %v2076_v60, %v624_v9 }
 0x3fc   :  { %v3324_v21 = vpop.f32.mrf.mxu1 }
 0x3fe   :  { %v2226_v22 = vpop.f32.mrf.mxu1 }
 0x400   :  { %v3334_v24 = vpop.f32.mrf.mxu1 }
 0x402   :  { %v2152_v30 = vpop.f32.mrf.mxu0 }
 0x403   :  { %v2153_v25 = vadd.f32 %v2152_v30, %v2077_v41 }
 0x404   :  { %v3329_v34 = vpop.f32.mrf.mxu0  ;;  %v2374_v26 = vpop.f32.mrf.mxu1 }
 0x405   :  { %v2227_v62 = vadd.f32 %v2226_v22, %v2153_v25 }
 0x406   :  { %v2300_v27 = vpop.f32.mrf.mxu0  ;;  %v3344_v56 = vpop.f32.mrf.mxu1 }
 0x407   :  { %v2301_v28 = vadd.f32 %v2300_v27, %v2227_v62 }
 0x408   :  { %v3339_v29 = vpop.f32.mrf.mxu0 }
 0x409   :  { %v2375_v35 = vadd.f32 %v2374_v26, %v2301_v28 }
 0x40a   :  { %v2446_v36 = vpop.f32.mrf.mxu0 }
 0x40b   :  { %v2447_v37 = vadd.f32 %v2446_v36, %v2375_v35 }
 0x40c   :  { %v3349_v40 = vpop.f32.mrf.mxu0 }
 0x40d   :  { %v3089_v42 = vmul.f32 -1.442695, %v2447_v37 }
 0x40f   :  { %3395 = vpow2.f32 %v3089_v42 }
 0x41c   :  { %v3396_v43 = vpop.eup %3395 }
 0x41d   :  { %v2453_v45 = vadd.f32 1.0, %v3396_v43 }
 0x41f   :  { %3397 = vrcp.f32 %v2453_v45 }
 0x42c   :  { %v3398_v51 = vpop.eup %3397 }
 0x42d   :  { %2456 = vst.msk [vmem:[#allocation3 + $0x4] sm:$0xf] %vm1082_vm5, %v3398_v51 }
 0x434   :  { %v2914_v52 = vld [vmem:[#allocation3] sm:$0xff] }
 0x435   :  { %3091 = vmatmul.mubr.msk.f32.vlgmr.msra.gmra.mxu1 %vm2916_vm6, %v2914_v52 }
 0x46d   :  { %v2533_v53 = vpop.f32.mrf.mxu1 }
 0x46e   :  { %v2534_v44 = vadd.f32 %v2533_v53, %v3766_v2 }
 0x46f   :  { %v3354_v54 = vpop.f32.mrf.mxu1 }
 0x471   :  { %v2683_v58 = vpop.f32.mrf.mxu1 }
 0x473   :  { %v3364_v55 = vpop.f32.mrf.mxu1 }
 0x475   :  { %v2609_v59 = vpop.f32.mrf.mxu0 }
 0x476   :  { %v2610_v61 = vadd.f32 %v2609_v59, %v2534_v44 }
 0x477   :  { %v3359_v39 = vpop.f32.mrf.mxu0  ;;  %v2831_v63 = vpop.f32.mrf.mxu1 }
 0x478   :  { %v2684_v0 = vadd.f32 %v2683_v58, %v2610_v61 }
 0x479   :  { %v2757_v1 = vpop.f32.mrf.mxu0  ;;  %v3374_v3 = vpop.f32.mrf.mxu1 }
 0x47a   :  { %v2758_v23 = vadd.f32 %v2757_v1, %v2684_v0 }
 0x47b   :  { %v3369_v12 = vpop.f32.mrf.mxu0 }
 0x47c   :  { %v2832_v4 = vadd.f32 %v2831_v63, %v2758_v23 }
 0x47d   :  { %v2903_v5 = vpop.f32.mrf.mxu0 }
 0x47e   :  { %v2904_v16 = vadd.f32 %v2903_v5, %v2832_v4 }
 0x47f   :  { %v3379_v6 = vpop.f32.mrf.mxu0 }
 0x480   :  { %v3090_v7 = vmul.f32 -1.442695, %v2904_v16 }
 0x482   :  { %3399 = vpow2.f32 %v3090_v7 }
 0x48f   :  { %v3400_v8 = vpop.eup %3399 }
 0x490   :  { %v2910_v38 = vadd.f32 1.0, %v3400_v8 }
 0x492   :  { %3401 = vrcp.f32 %v2910_v38 }
 0x49f   :  { %v3402_v9 = vpop.eup %3401 }
 0x4a0   :  { %2913 = vst.msk [vmem:[#allocation4 + $0x4] sm:$0xf] %vm1082_vm5, %v3402_v9 }
 0x4a7   :  { %v2915_v2 = vld [vmem:[#allocation4] sm:$0xff] }
 0x4a8   :  { %3092 = vmatmul.mubr.msk.f32.vlgmr.msra.gmra.mxu0 %vm2916_vm6, %v2915_v2 }
 0x4f5   :  { %v2986_v31 = vpop.f32.mrf.mxu1 }
 0x4f7   :  { %v2988_v14 = vpop.f32.mrf.mxu1 }
 0x568   :  { %v3060_v10 = vpop.f32.mrf.mxu0 }
 0x569   :  { %v3067_v11 = vmul.f32 %v3060_v10, %v2986_v31 }
 0x56a   :  { %v3062_v48 = vpop.f32.mrf.mxu0 }
 0x56b   :  { %v3069_v15 = vmul.f32 %v3067_v11, %v3590_v33  ;;  %v3068_v17 = vmul.f32 %v3062_v48, %v2988_v14 }
 0x56d   :  { %3071 = vst [vmem:[#allocation5] sm:$0xff] %v3069_v15  ;;  %v3070_v57 = vmul.f32 %v3068_v17, %v3527_v13 }
 0x56f   :  { %3072 = vst [vmem:[#allocation5 + $0x8] sm:$0xff] %v3070_v57 }
 0x570   :  { %3414 = shalt.err (!%p3411_p4)
}
 0x571   :  { %3082 = dma.vmem_to_hbm [thread:$0]  %s3080_s1, 256, %s3870_s10, [#allocation6]  }
 0x572   :  { %3423 = dma.done.wait [#allocation6], 256  }
 0x573   :  { %3424 = vsyncadd [#allocation6], 4294967040 }
 0x574   :  { %3086 = vsyncpa [#allocation6], 1 }

</bundles_post_ra>
